<compile_context>
chip_gen: v7x
topology: tpu7x:2x2x1
jax: 0.10.0
libtpu: 0.0.40
codegen_flags: <defaults>
</compile_context>

<pallas_src>
import jax
import jax.numpy as jnp
import numpy as np
from jax import lax
from jax.experimental import pallas as pl
from jax.experimental.pallas import tpu as pltpu

_BN_EPS = 1e-5
_NORM_EPS_SQ = 1e-24          # (F.normalize eps = 1e-12)^2


# ----------------------------------------------------------------------------- #
# Fused forward: contrastive logits + distillation loss in one pallas_call.
# ----------------------------------------------------------------------------- #
def moco_distill_forward(zq_im_q, zq_im_k, zk_im_k, t_im_q, t_im_k,
                         head_q_params, head_k_params, predictor_params,
                         queue, temperature=0.07):
    """Feature-level MoCo_distill forward.

    zq_im_q = encoder_q(im_q), zq_im_k = encoder_q(im_k), zk_im_k = encoder_k(im_k),
    t_im_q/t_im_k = teacher features (frozen). Returns ((logits, labels), loss_kd).
    """
    wq, bq = head_q_params
    wk, bk = head_k_params
    w1, b1, gamma, beta, w2, b2 = predictor_params
    bsz, s_dim = zq_im_q.shape
    h_dim = w1.shape[1]
    t_dim = w2.shape[1]
    n_keys = queue.shape[1]
    inv_t = 1.0 / float(temperature)
    inv_b = 1.0 / float(bsz)

    # One student-feature slab (one DMA): [encoder_q(im_q); encoder_q(im_k); encoder_k(im_k)].
    z_all = jnp.concatenate([zq_im_q, zq_im_k, zk_im_k], axis=0)         # (3*bsz, s_dim)
    # One teacher slab; D() detaches the target / teacher is frozen.
    t_cat = lax.stop_gradient(jnp.concatenate([t_im_q, t_im_k], axis=0))  # (2*bsz, t_dim)
    # TODO(synk): wrap in jax.custom_vjp if this loss is ever differentiated for training.

    # All 1-row params in ONE packed input (one tiny DMA instead of six).
    pdim = max(s_dim, h_dim, t_dim)
    pack = jnp.zeros((6, pdim), jnp.float32)
    pack = pack.at[0, :s_dim].set(bq)
    pack = pack.at[1, :s_dim].set(bk)
    pack = pack.at[2, :h_dim].set(b1)
    pack = pack.at[3, :h_dim].set(gamma)
    pack = pack.at[4, :h_dim].set(beta)
    pack = pack.at[5, :t_dim].set(b2)

    def kernel(z_ref, t_ref, wq_ref, wk_ref, w1_ref, w2_ref, queue_ref, pk_ref,
               lpos_ref, lneg_ref, loss_ref):
        z = z_ref[...]                                 # (3*bsz, s_dim) f32
        zb = z.astype(jnp.bfloat16)                    # cast once, slice for all matmuls
        pk = pk_ref[...]
        bq_ = pk[0:1, :s_dim]
        bk_ = pk[1:2, :s_dim]
        b1_ = pk[2:3, :h_dim]
        gamma_ = pk[3:4, :h_dim]
        beta_ = pk[4:5, :h_dim]
        b2_ = pk[5:6, :t_dim]

        z1b = zb[0:bsz]                                # encoder_q(im_q)
        zkb = zb[2 * bsz:3 * bsz]                      # encoder_k(im_k)
        z12b = zb[0:2 * bsz]                           # [z1; z2] for the predictor

        # ---- contrastive branch: head_q / head_k (+ReLU), L2-normalize, logits ----
        q = jnp.maximum(
            jnp.dot(z1b, wq_ref[...].astype(jnp.bfloat16),
                    preferred_element_type=jnp.float32) + bq_, 0.0)      # (bsz, s_dim)
        k = jnp.maximum(
            jnp.dot(zkb, wk_ref[...].astype(jnp.bfloat16),
                    preferred_element_type=jnp.float32) + bk_, 0.0)      # (bsz, s_dim)
        qq = jnp.sum(q * q, axis=1, keepdims=True)
        kk = jnp.sum(k * k, axis=1, keepdims=True)
        qk = jnp.sum(q * k, axis=1, keepdims=True)
        # 1/T folded into q's rsqrt so the wide (bsz, K) l_neg tile needs no post-scale.
        q_inv_t = lax.rsqrt(jnp.maximum(qq, _NORM_EPS_SQ)) * inv_t
        k_inv = lax.rsqrt(jnp.maximum(kk, _NORM_EPS_SQ))
        lpos_ref[...] = qk * q_inv_t * k_inv                              # (bsz, 1)
        q_scaled = (q * q_inv_t).astype(jnp.bfloat16)                     # normalized q / T
        lneg_ref[...] = jnp.dot(q_scaled, queue_ref[...].astype(jnp.bfloat16),
                                preferred_element_type=jnp.float32)       # (bsz, K)

        # ---- distillation branch: predictor = Linear -> BN1d(train) -> ReLU -> Linear ----
        # Linear 1 fused over both branches (single MXU weight push).
        h = jnp.dot(z12b, w1_ref[...].astype(jnp.bfloat16),
                    preferred_element_type=jnp.float32) + b1_             # (2*bsz, h_dim)

        # BatchNorm1d (training mode, biased var) with statistics PER bsz-half.
        row = lax.broadcasted_iota(jnp.int32, (2 * bsz, 1), 0)
        m1 = (row < bsz).astype(jnp.float32)                              # (2*bsz, 1)
        m2 = 1.0 - m1

        def bn_fold(mask):
            mu = jnp.sum(h * mask, axis=0, keepdims=True) * inv_b         # (1, h_dim)
            d = h - mu
            var = jnp.sum(d * d * mask, axis=0, keepdims=True) * inv_b
            scale = gamma_ * lax.rsqrt(var + _BN_EPS)
            shift = beta_ - mu * scale
            return scale, shift

        s1, o1 = bn_fold(m1)
        s2, o2 = bn_fold(m2)
        scale = m1 * s1 + m2 * s2                      # per-row select of the branch's fold
        shift = m1 * o1 + m2 * o2
        a = jnp.maximum(h * scale + shift, 0.0)        # BN + ReLU as one FMA + max

        # Linear 2, fused over both branches.
        p = jnp.dot(a.astype(jnp.bfloat16), w2_ref[...].astype(jnp.bfloat16),
                    preferred_element_type=jnp.float32) + b2_             # (2*bsz, t_dim)

        # D(p, t) = -mean cosine, via row-norm columns + rsqrt (no full-width divides).
        t = t_ref[...]
        pp = jnp.sum(p * p, axis=1, keepdims=True)
        tt = jnp.sum(t * t, axis=1, keepdims=True)
        pt = jnp.sum(p * t, axis=1, keepdims=True)
        sim = (pt
               * lax.rsqrt(jnp.maximum(pp, _NORM_EPS_SQ))
               * lax.rsqrt(jnp.maximum(tt, _NORM_EPS_SQ)))                # (2*bsz, 1)
        # D(p1,t1)/2 + D(p2,t2)/2 == -mean over all 2*bsz rows (halves are equal size).
        loss_ref[0, 0] = -jnp.mean(sim)

    vmem = lambda: pl.BlockSpec(memory_space=pltpu.MemorySpace.VMEM)
    l_pos, l_neg, loss = pl.pallas_call(
        kernel,
        out_shape=(jax.ShapeDtypeStruct((bsz, 1), jnp.float32),
                   jax.ShapeDtypeStruct((bsz, n_keys), jnp.float32),
                   jax.ShapeDtypeStruct((1, 1), jnp.float32)),
        in_specs=[vmem() for _ in range(8)],
        out_specs=(vmem(), vmem(),
                   pl.BlockSpec(memory_space=pltpu.MemorySpace.SMEM)),
    )(z_all, t_cat, wq, wk, w1, w2, queue, pack)

    logits = jnp.concatenate([l_pos, l_neg], axis=1)
    labels = jnp.zeros((bsz,), jnp.int32)              # torch.long zeros in PyTorch
    return (logits, labels), loss[0, 0]


# ----------------------------------------------------------------------------- #
# Plain-JAX references (same bf16 MXU-operand precision as the kernel; all
# statistics / normalization in f32 — matches the PyTorch forward math otherwise).
# ----------------------------------------------------------------------------- #
def _ref_contrast_logits(zq, zk, wq, bq, wk, bk, queue, temperature):
    inv_t = 1.0 / temperature
    q = jnp.maximum(jnp.dot(zq.astype(jnp.bfloat16), wq.astype(jnp.bfloat16),
                            preferred_element_type=jnp.float32) + bq, 0.0)
    k = jnp.maximum(jnp.dot(zk.astype(jnp.bfloat16), wk.astype(jnp.bfloat16),
                            preferred_element_type=jnp.float32) + bk, 0.0)
    qn = q / jnp.maximum(jnp.linalg.norm(q, axis=1, keepdims=True), 1e-12)
    kn = k / jnp.maximum(jnp.linalg.norm(k, axis=1, keepdims=True), 1e-12)
    l_pos = jnp.sum(qn * kn, axis=1, keepdims=True) * inv_t
    # 1/T folded into q before the bf16 cast, matching the kernel's operand rounding
    # (mathematically identical to dividing the logits by T afterwards).
    l_neg = jnp.dot((qn * inv_t).astype(jnp.bfloat16), queue.astype(jnp.bfloat16),
                    preferred_element_type=jnp.float32)
    return jnp.concatenate([l_pos, l_neg], axis=1)


def _ref_kd_loss(z1, z2, t1, t2, params):
    w1, b1, gamma, beta, w2, b2 = params

    def predictor(z):
        h = jnp.dot(z.astype(jnp.bfloat16), w1.astype(jnp.bfloat16),
                    preferred_element_type=jnp.float32) + b1
        mu = h.mean(axis=0, keepdims=True)
        var = ((h - mu) ** 2).mean(axis=0, keepdims=True)
        h = (h - mu) / jnp.sqrt(var + _BN_EPS) * gamma + beta
        h = jnp.maximum(h, 0.0)
        return jnp.dot(h.astype(jnp.bfloat16), w2.astype(jnp.bfloat16),
                       preferred_element_type=jnp.float32) + b2

    def D(p, t):
        pn = p / jnp.maximum(jnp.linalg.norm(p, axis=1, keepdims=True), 1e-12)
        tn = t / jnp.maximum(jnp.linalg.norm(t, axis=1, keepdims=True), 1e-12)
        return -jnp.mean(jnp.sum(pn * tn, axis=1))

    return 0.5 * D(predictor(z1), t1) + 0.5 * D(predictor(z2), t2)


if __name__ == "__main__":
    bsz, s_dim, h_dim, t_dim, n_keys, temperature = 4, 32, 64, 32, 512, 0.07
    key = jax.random.PRNGKey(0)
    ks = jax.random.split(key, 16)

    # Backbone feature outputs (encoder_q / encoder_k / teacher are external modules).
    zq_im_q = jax.random.normal(ks[0], (bsz, s_dim), jnp.float32)   # encoder_q(im_q)
    zq_im_k = jax.random.normal(ks[1], (bsz, s_dim), jnp.float32)   # encoder_q(im_k)
    zk_im_k = jax.random.normal(ks[2], (bsz, s_dim), jnp.float32)   # encoder_k(im_k)
    t_im_q = jax.random.normal(ks[3], (bsz, t_dim), jnp.float32)    # teacher(im_q)
    t_im_k = jax.random.normal(ks[4], (bsz, t_dim), jnp.float32)    # teacher(im_k)

    # head_q / head_k = Linear(s_dim, s_dim) + ReLU   (weights stored as (in, out)).
    wq = jax.random.normal(ks[5], (s_dim, s_dim), jnp.float32) * 0.1
    bq = jax.random.normal(ks[6], (s_dim,), jnp.float32) * 0.02
    wk = jax.random.normal(ks[7], (s_dim, s_dim), jnp.float32) * 0.1
    bk = jax.random.normal(ks[8], (s_dim,), jnp.float32) * 0.02

    # queue buffer: (s_dim, K), column-normalized as in the module __init__.
    queue = jax.random.normal(ks[9], (s_dim, n_keys), jnp.float32)
    queue = queue / jnp.linalg.norm(queue, axis=0, keepdims=True)

    # prediction_MLP(in=s_dim, hidden=h_dim, out=t_dim): Linear -> BN1d -> ReLU -> Linear.
    w1 = jax.random.normal(ks[10], (s_dim, h_dim), jnp.float32) * 0.05
    b1 = jax.random.normal(ks[11], (h_dim,), jnp.float32) * 0.02
    gamma = 1.0 + 0.1 * jax.random.normal(ks[12], (h_dim,), jnp.float32)
    beta = 0.05 * jax.random.normal(ks[13], (h_dim,), jnp.float32)
    w2 = jax.random.normal(ks[14], (h_dim, t_dim), jnp.float32) * 0.05
    b2 = jax.random.normal(ks[15], (t_dim,), jnp.float32) * 0.02
    pred_params = (w1, b1, gamma, beta, w2, b2)

    # ---- Pallas forward (single fused kernel) ----
    (logits, labels), loss_kd = moco_distill_forward(
        zq_im_q, zq_im_k, zk_im_k, t_im_q, t_im_k,
        (wq, bq), (wk, bk), pred_params, queue, temperature)
    jax.block_until_ready((logits, labels, loss_kd))

    # TODO(synk): _momentum_update_key_encoder and _dequeue_and_enqueue are stateful
    # in-place parameter/queue mutations (with queue_ptr wrap-around); they belong to
    # the surrounding training step (plain XLA lerp / dynamic_update_slice), not a kernel.

    # ---- Correctness vs plain-JAX references ----
    ref_logits = _ref_contrast_logits(zq_im_q, zk_im_k, wq, bq, wk, bk, queue, temperature)
    ref_loss = _ref_kd_loss(zq_im_q, zq_im_k, t_im_q, t_im_k, pred_params)
    np.testing.assert_allclose(np.asarray(logits), np.asarray(ref_logits),
                               rtol=1e-2, atol=1e-2)
    np.testing.assert_allclose(np.asarray(loss_kd), np.asarray(ref_loss),
                               rtol=1e-2, atol=1e-2)
    assert labels.shape == (bsz,) and int(labels.sum()) == 0
    print("KERNEL_OK")
</pallas_src>

<mosaic_0001>
module attributes {stable_mosaic.version = 11 : i64} {
  func.func @kernel(%arg0: memref<12x32xf32, #tpu.memory_space<vmem>>, %arg1: memref<8x32xf32, #tpu.memory_space<vmem>>, %arg2: memref<32x32xf32, #tpu.memory_space<vmem>>, %arg3: memref<32x32xf32, #tpu.memory_space<vmem>>, %arg4: memref<32x64xf32, #tpu.memory_space<vmem>>, %arg5: memref<64x32xf32, #tpu.memory_space<vmem>>, %arg6: memref<32x512xf32, #tpu.memory_space<vmem>>, %arg7: memref<6x64xf32, #tpu.memory_space<vmem>>, %arg8: memref<4x1xf32, #tpu.memory_space<vmem>>, %arg9: memref<4x512xf32, #tpu.memory_space<vmem>>, %arg10: memref<1x1xf32, #tpu.memory_space<smem>>) attributes {dimension_semantics = [], scalar_prefetch = 0 : i64, scratch_operands = 0 : i64, tpu.core_type = #tpu.core_type<tc>} {
    %c0 = arith.constant 0 : index
    %c0_0 = arith.constant 0 : index
    %0 = vector.load %arg0[%c0, %c0_0] : memref<12x32xf32, #tpu.memory_space<vmem>>, vector<12x32xf32>
    %1 = arith.truncf %0 : vector<12x32xf32> to vector<12x32xbf16>
    %c0_1 = arith.constant 0 : index
    %c0_2 = arith.constant 0 : index
    %2 = vector.load %arg7[%c0_1, %c0_2] : memref<6x64xf32, #tpu.memory_space<vmem>>, vector<6x64xf32>
    %3 = vector.extract_strided_slice %2 {offsets = [0, 0], sizes = [1, 32], strides = [1, 1]} : vector<6x64xf32> to vector<1x32xf32>
    %4 = vector.extract_strided_slice %2 {offsets = [1, 0], sizes = [1, 32], strides = [1, 1]} : vector<6x64xf32> to vector<1x32xf32>
    %5 = vector.extract_strided_slice %2 {offsets = [2, 0], sizes = [1, 64], strides = [1, 1]} : vector<6x64xf32> to vector<1x64xf32>
    %6 = vector.extract_strided_slice %2 {offsets = [3, 0], sizes = [1, 64], strides = [1, 1]} : vector<6x64xf32> to vector<1x64xf32>
    %7 = vector.extract_strided_slice %2 {offsets = [4, 0], sizes = [1, 64], strides = [1, 1]} : vector<6x64xf32> to vector<1x64xf32>
    %8 = vector.extract_strided_slice %2 {offsets = [5, 0], sizes = [1, 32], strides = [1, 1]} : vector<6x64xf32> to vector<1x32xf32>
    %9 = vector.extract_strided_slice %1 {offsets = [0, 0], sizes = [4, 32], strides = [1, 1]} : vector<12x32xbf16> to vector<4x32xbf16>
    %10 = vector.extract_strided_slice %1 {offsets = [8, 0], sizes = [4, 32], strides = [1, 1]} : vector<12x32xbf16> to vector<4x32xbf16>
    %11 = vector.extract_strided_slice %1 {offsets = [0, 0], sizes = [8, 32], strides = [1, 1]} : vector<12x32xbf16> to vector<8x32xbf16>
    %c0_3 = arith.constant 0 : index
    %c0_4 = arith.constant 0 : index
    %12 = vector.load %arg2[%c0_3, %c0_4] : memref<32x32xf32, #tpu.memory_space<vmem>>, vector<32x32xf32>
    %13 = arith.truncf %12 : vector<32x32xf32> to vector<32x32xbf16>
    %cst = arith.constant dense<0.000000e+00> : vector<4x32xf32>
    %14 = tpu.matmul %9, %13, %cst {dimension_numbers = #tpu.dot_dimension_numbers<[1], [0], [0], [1], [0, 0, 1, 1], [], []>} : vector<4x32xbf16>, vector<32x32xbf16>, vector<4x32xf32> -> vector<4x32xf32>
    %15 = vector.broadcast %3 : vector<1x32xf32> to vector<4x32xf32>
    %16 = arith.addf %14, %15 : vector<4x32xf32>
    %cst_5 = arith.constant 0.000000e+00 : f32
    %17 = vector.broadcast %cst_5 : f32 to vector<4x32xf32>
    %18 = arith.maximumf %16, %17 : vector<4x32xf32>
    %c0_6 = arith.constant 0 : index
    %c0_7 = arith.constant 0 : index
    %19 = vector.load %arg3[%c0_6, %c0_7] : memref<32x32xf32, #tpu.memory_space<vmem>>, vector<32x32xf32>
    %20 = arith.truncf %19 : vector<32x32xf32> to vector<32x32xbf16>
    %cst_8 = arith.constant dense<0.000000e+00> : vector<4x32xf32>
    %21 = tpu.matmul %10, %20, %cst_8 {dimension_numbers = #tpu.dot_dimension_numbers<[1], [0], [0], [1], [0, 0, 1, 1], [], []>} : vector<4x32xbf16>, vector<32x32xbf16>, vector<4x32xf32> -> vector<4x32xf32>
    %22 = vector.broadcast %4 : vector<1x32xf32> to vector<4x32xf32>
    %23 = arith.addf %21, %22 : vector<4x32xf32>
    %cst_9 = arith.constant 0.000000e+00 : f32
    %24 = vector.broadcast %cst_9 : f32 to vector<4x32xf32>
    %25 = arith.maximumf %23, %24 : vector<4x32xf32>
    %26 = arith.mulf %18, %18 : vector<4x32xf32>
    %cst_10 = arith.constant dense<0.000000e+00> : vector<4xf32>
    %27 = vector.multi_reduction <add>, %26, %cst_10 [1] : vector<4x32xf32> to vector<4xf32>
    %28 = vector.shape_cast %27 : vector<4xf32> to vector<4x1xf32>
    %29 = arith.mulf %25, %25 : vector<4x32xf32>
    %cst_11 = arith.constant dense<0.000000e+00> : vector<4xf32>
    %30 = vector.multi_reduction <add>, %29, %cst_11 [1] : vector<4x32xf32> to vector<4xf32>
    %31 = vector.shape_cast %30 : vector<4xf32> to vector<4x1xf32>
    %32 = arith.mulf %18, %25 : vector<4x32xf32>
    %cst_12 = arith.constant dense<0.000000e+00> : vector<4xf32>
    %33 = vector.multi_reduction <add>, %32, %cst_12 [1] : vector<4x32xf32> to vector<4xf32>
    %34 = vector.shape_cast %33 : vector<4xf32> to vector<4x1xf32>
    %cst_13 = arith.constant 1.000000e-24 : f32
    %35 = vector.broadcast %cst_13 : f32 to vector<4x1xf32>
    %36 = arith.maximumf %28, %35 : vector<4x1xf32>
    %37 = math.rsqrt %36 : vector<4x1xf32>
    %cst_14 = arith.constant 14.2857141 : f32
    %38 = vector.broadcast %cst_14 : f32 to vector<4x1xf32>
    %39 = arith.mulf %37, %38 : vector<4x1xf32>
    %cst_15 = arith.constant 1.000000e-24 : f32
    %40 = vector.broadcast %cst_15 : f32 to vector<4x1xf32>
    %41 = arith.maximumf %31, %40 : vector<4x1xf32>
    %42 = math.rsqrt %41 : vector<4x1xf32>
    %43 = arith.mulf %34, %39 : vector<4x1xf32>
    %44 = arith.mulf %43, %42 : vector<4x1xf32>
    %c0_16 = arith.constant 0 : index
    %c0_17 = arith.constant 0 : index
    %45 = vector.load %arg8[%c0_16, %c0_17] : memref<4x1xf32, #tpu.memory_space<vmem>>, vector<4x1xf32>
    tpu.vector_store %arg8[%c0_16, %c0_17], %44 {strides = array<i32>} : memref<4x1xf32, #tpu.memory_space<vmem>>, vector<4x1xf32>,
    %46 = vector.broadcast %39 : vector<4x1xf32> to vector<4x32xf32>
    %47 = arith.mulf %18, %46 : vector<4x32xf32>
    %48 = arith.truncf %47 : vector<4x32xf32> to vector<4x32xbf16>
    %c0_18 = arith.constant 0 : index
    %c0_19 = arith.constant 0 : index
    %49 = vector.load %arg6[%c0_18, %c0_19] : memref<32x512xf32, #tpu.memory_space<vmem>>, vector<32x512xf32>
    %50 = arith.truncf %49 : vector<32x512xf32> to vector<32x512xbf16>
    %cst_20 = arith.constant dense<0.000000e+00> : vector<4x512xf32>
    %51 = tpu.matmul %48, %50, %cst_20 {dimension_numbers = #tpu.dot_dimension_numbers<[1], [0], [0], [1], [0, 0, 1, 1], [], []>} : vector<4x32xbf16>, vector<32x512xbf16>, vector<4x512xf32> -> vector<4x512xf32>
    %c0_21 = arith.constant 0 : index
    %c0_22 = arith.constant 0 : index
    %52 = vector.load %arg9[%c0_21, %c0_22] : memref<4x512xf32, #tpu.memory_space<vmem>>, vector<4x512xf32>
    tpu.vector_store %arg9[%c0_21, %c0_22], %51 {strides = array<i32>} : memref<4x512xf32, #tpu.memory_space<vmem>>, vector<4x512xf32>,
    %c0_23 = arith.constant 0 : index
    %c0_24 = arith.constant 0 : index
    %53 = vector.load %arg4[%c0_23, %c0_24] : memref<32x64xf32, #tpu.memory_space<vmem>>, vector<32x64xf32>
    %54 = arith.truncf %53 : vector<32x64xf32> to vector<32x64xbf16>
    %cst_25 = arith.constant dense<0.000000e+00> : vector<8x64xf32>
    %55 = tpu.matmul %11, %54, %cst_25 {dimension_numbers = #tpu.dot_dimension_numbers<[1], [0], [0], [1], [0, 0, 1, 1], [], []>} : vector<8x32xbf16>, vector<32x64xbf16>, vector<8x64xf32> -> vector<8x64xf32>
    %56 = vector.broadcast %5 : vector<1x64xf32> to vector<8x64xf32>
    %57 = arith.addf %55, %56 : vector<8x64xf32>
    %58 = tpu.iota {dimensions = array<i32: 0>} : vector<8x1xi32>
    %c4_i32 = arith.constant 4 : i32
    %59 = vector.broadcast %c4_i32 : i32 to vector<8x1xi32>
    %60 = arith.cmpi slt, %58, %59 : vector<8x1xi32>
    %61 = arith.extui %60 : vector<8x1xi1> to vector<8x1xi32>
    %62 = arith.sitofp %61 : vector<8x1xi32> to vector<8x1xf32>
    %cst_26 = arith.constant 1.000000e+00 : f32
    %63 = vector.broadcast %cst_26 : f32 to vector<8x1xf32>
    %64 = arith.subf %63, %62 : vector<8x1xf32>
    %65 = vector.broadcast %62 : vector<8x1xf32> to vector<8x64xf32>
    %66 = arith.mulf %57, %65 : vector<8x64xf32>
    %cst_27 = arith.constant dense<0.000000e+00> : vector<64xf32>
    %67 = vector.multi_reduction <add>, %66, %cst_27 [0] : vector<8x64xf32> to vector<64xf32>
    %68 = vector.shape_cast %67 : vector<64xf32> to vector<1x64xf32>
    %cst_28 = arith.constant 2.500000e-01 : f32
    %69 = vector.broadcast %cst_28 : f32 to vector<1x64xf32>
    %70 = arith.mulf %68, %69 : vector<1x64xf32>
    %71 = vector.broadcast %70 : vector<1x64xf32> to vector<8x64xf32>
    %72 = arith.subf %57, %71 : vector<8x64xf32>
    %73 = arith.mulf %72, %72 : vector<8x64xf32>
    %74 = vector.broadcast %62 : vector<8x1xf32> to vector<8x64xf32>
    %75 = arith.mulf %73, %74 : vector<8x64xf32>
    %cst_29 = arith.constant dense<0.000000e+00> : vector<64xf32>
    %76 = vector.multi_reduction <add>, %75, %cst_29 [0] : vector<8x64xf32> to vector<64xf32>
    %77 = vector.shape_cast %76 : vector<64xf32> to vector<1x64xf32>
    %cst_30 = arith.constant 2.500000e-01 : f32
    %78 = vector.broadcast %cst_30 : f32 to vector<1x64xf32>
    %79 = arith.mulf %77, %78 : vector<1x64xf32>
    %cst_31 = arith.constant 9.99999974E-6 : f32
    %80 = vector.broadcast %cst_31 : f32 to vector<1x64xf32>
    %81 = arith.addf %79, %80 : vector<1x64xf32>
    %82 = math.rsqrt %81 : vector<1x64xf32>
    %83 = arith.mulf %6, %82 : vector<1x64xf32>
    %84 = arith.mulf %70, %83 : vector<1x64xf32>
    %85 = arith.subf %7, %84 : vector<1x64xf32>
    %86 = vector.broadcast %64 : vector<8x1xf32> to vector<8x64xf32>
    %87 = arith.mulf %57, %86 : vector<8x64xf32>
    %cst_32 = arith.constant dense<0.000000e+00> : vector<64xf32>
    %88 = vector.multi_reduction <add>, %87, %cst_32 [0] : vector<8x64xf32> to vector<64xf32>
    %89 = vector.shape_cast %88 : vector<64xf32> to vector<1x64xf32>
    %cst_33 = arith.constant 2.500000e-01 : f32
    %90 = vector.broadcast %cst_33 : f32 to vector<1x64xf32>
    %91 = arith.mulf %89, %90 : vector<1x64xf32>
    %92 = vector.broadcast %91 : vector<1x64xf32> to vector<8x64xf32>
    %93 = arith.subf %57, %92 : vector<8x64xf32>
    %94 = arith.mulf %93, %93 : vector<8x64xf32>
    %95 = vector.broadcast %64 : vector<8x1xf32> to vector<8x64xf32>
    %96 = arith.mulf %94, %95 : vector<8x64xf32>
    %cst_34 = arith.constant dense<0.000000e+00> : vector<64xf32>
    %97 = vector.multi_reduction <add>, %96, %cst_34 [0] : vector<8x64xf32> to vector<64xf32>
    %98 = vector.shape_cast %97 : vector<64xf32> to vector<1x64xf32>
    %cst_35 = arith.constant 2.500000e-01 : f32
    %99 = vector.broadcast %cst_35 : f32 to vector<1x64xf32>
    %100 = arith.mulf %98, %99 : vector<1x64xf32>
    %cst_36 = arith.constant 9.99999974E-6 : f32
    %101 = vector.broadcast %cst_36 : f32 to vector<1x64xf32>
    %102 = arith.addf %100, %101 : vector<1x64xf32>
    %103 = math.rsqrt %102 : vector<1x64xf32>
    %104 = arith.mulf %6, %103 : vector<1x64xf32>
    %105 = arith.mulf %91, %104 : vector<1x64xf32>
    %106 = arith.subf %7, %105 : vector<1x64xf32>
    %107 = vector.broadcast %62 : vector<8x1xf32> to vector<8x64xf32>
    %108 = vector.broadcast %83 : vector<1x64xf32> to vector<8x64xf32>
    %109 = arith.mulf %107, %108 : vector<8x64xf32>
    %110 = vector.broadcast %64 : vector<8x1xf32> to vector<8x64xf32>
    %111 = vector.broadcast %104 : vector<1x64xf32> to vector<8x64xf32>
    %112 = arith.mulf %110, %111 : vector<8x64xf32>
    %113 = arith.addf %109, %112 : vector<8x64xf32>
    %114 = vector.broadcast %62 : vector<8x1xf32> to vector<8x64xf32>
    %115 = vector.broadcast %85 : vector<1x64xf32> to vector<8x64xf32>
    %116 = arith.mulf %114, %115 : vector<8x64xf32>
    %117 = vector.broadcast %64 : vector<8x1xf32> to vector<8x64xf32>
    %118 = vector.broadcast %106 : vector<1x64xf32> to vector<8x64xf32>
    %119 = arith.mulf %117, %118 : vector<8x64xf32>
    %120 = arith.addf %116, %119 : vector<8x64xf32>
    %121 = arith.mulf %57, %113 : vector<8x64xf32>
    %122 = arith.addf %121, %120 : vector<8x64xf32>
    %cst_37 = arith.constant 0.000000e+00 : f32
    %123 = vector.broadcast %cst_37 : f32 to vector<8x64xf32>
    %124 = arith.maximumf %122, %123 : vector<8x64xf32>
    %125 = arith.truncf %124 : vector<8x64xf32> to vector<8x64xbf16>
    %c0_38 = arith.constant 0 : index
    %c0_39 = arith.constant 0 : index
    %126 = vector.load %arg5[%c0_38, %c0_39] : memref<64x32xf32, #tpu.memory_space<vmem>>, vector<64x32xf32>
    %127 = arith.truncf %126 : vector<64x32xf32> to vector<64x32xbf16>
    %cst_40 = arith.constant dense<0.000000e+00> : vector<8x32xf32>
    %128 = tpu.matmul %125, %127, %cst_40 {dimension_numbers = #tpu.dot_dimension_numbers<[1], [0], [0], [1], [0, 0, 1, 1], [], []>} : vector<8x64xbf16>, vector<64x32xbf16>, vector<8x32xf32> -> vector<8x32xf32>
    %129 = vector.broadcast %8 : vector<1x32xf32> to vector<8x32xf32>
    %130 = arith.addf %128, %129 : vector<8x32xf32>
    %c0_41 = arith.constant 0 : index
    %c0_42 = arith.constant 0 : index
    %131 = vector.load %arg1[%c0_41, %c0_42] : memref<8x32xf32, #tpu.memory_space<vmem>>, vector<8x32xf32>
    %132 = arith.mulf %130, %130 : vector<8x32xf32>
    %cst_43 = arith.constant dense<0.000000e+00> : vector<8xf32>
    %133 = vector.multi_reduction <add>, %132, %cst_43 [1] : vector<8x32xf32> to vector<8xf32>
    %134 = vector.shape_cast %133 : vector<8xf32> to vector<8x1xf32>
    %135 = arith.mulf %131, %131 : vector<8x32xf32>
    %cst_44 = arith.constant dense<0.000000e+00> : vector<8xf32>
    %136 = vector.multi_reduction <add>, %135, %cst_44 [1] : vector<8x32xf32> to vector<8xf32>
    %137 = vector.shape_cast %136 : vector<8xf32> to vector<8x1xf32>
    %138 = arith.mulf %130, %131 : vector<8x32xf32>
    %cst_45 = arith.constant dense<0.000000e+00> : vector<8xf32>
    %139 = vector.multi_reduction <add>, %138, %cst_45 [1] : vector<8x32xf32> to vector<8xf32>
    %140 = vector.shape_cast %139 : vector<8xf32> to vector<8x1xf32>
    %cst_46 = arith.constant 1.000000e-24 : f32
    %141 = vector.broadcast %cst_46 : f32 to vector<8x1xf32>
    %142 = arith.maximumf %134, %141 : vector<8x1xf32>
    %143 = math.rsqrt %142 : vector<8x1xf32>
    %144 = arith.mulf %140, %143 : vector<8x1xf32>
    %cst_47 = arith.constant 1.000000e-24 : f32
    %145 = vector.broadcast %cst_47 : f32 to vector<8x1xf32>
    %146 = arith.maximumf %137, %145 : vector<8x1xf32>
    %147 = math.rsqrt %146 : vector<8x1xf32>
    %148 = arith.mulf %144, %147 : vector<8x1xf32>
    %149 = vector.shape_cast %148 : vector<8x1xf32> to vector<1x8x1xf32>
    %cst_48 = arith.constant dense<0.000000e+00> : vector<1xf32>
    %150 = vector.multi_reduction <add>, %149, %cst_48 [1, 2] : vector<1x8x1xf32> to vector<1xf32>
    %151 = vector.shape_cast %150 : vector<1xf32> to vector<1x1x1xf32>
    %152 = vector.extract %151[0, 0, 0] : f32 from vector<1x1x1xf32>
    %cst_49 = arith.constant 8.000000e+00 : f32
    %153 = arith.divf %152, %cst_49 : f32
    %cst_50 = arith.constant 0.000000e+00 : f32
    %154 = arith.subf %cst_50, %153 : f32
    %c0_51 = arith.constant 0 : index
    %c0_52 = arith.constant 0 : index
    %155 = memref.load %arg10[%c0_51, %c0_52] : memref<1x1xf32, #tpu.memory_space<smem>>
    memref.store %154, %arg10[%c0_51, %c0_52] : memref<1x1xf32, #tpu.memory_space<smem>>
    return
  }
}

</mosaic_0001>

<bundles_post_ra>
// kernel: tpu_custom_call.1
= control target key start
LH: loop header
LB: loop body
LE: loop exit
PB: predicated region body
PF: predicated region fallthrough
CT: control target
= control target key end

     0   :  { %16 = vsyncpa [#allocation3], 0  ;;  %s1080_s0 = inlined_call_operand.hbm [shape: f32[12,32], index: 0, kind: input, shape index: {}]   ;;  %s1081_s1 = inlined_call_operand.hbm [shape: f32[8,32], index: 1, kind: input, shape index: {}]   ;;  %s1082_s2 = inlined_call_operand.vmem [shape: f32[32,32], index: 2, kind: input, shape index: {}]   ;;  %s1083_s3 = inlined_call_operand.vmem [shape: f32[32,32], index: 3, kind: input, shape index: {}]   ;;  %s1084_s4 = inlined_call_operand.vmem [shape: f32[32,64], index: 4, kind: input, shape index: {}]   ;;  %s1085_s5 = inlined_call_operand.vmem [shape: f32[64,32], index: 5, kind: input, shape index: {}]   ;;  %s1086_s6 = inlined_call_operand.hbm [shape: f32[32,512], index: 6, kind: input, shape index: {}]   ;;  %s1087_s7 = inlined_call_operand.vmem [shape: f32[6,64], index: 7, kind: input, shape index: {}]   ;;  %s1088_s8 = inlined_call_operand.vmem [shape: f32[4,1], index: 8, kind: output, shape index: {0}]   ;;  %s1089_s9 = inlined_call_operand.hbm [shape: f32[4,512], index: 9, kind: output, shape index: {1}]   ;;  %s1090_s10 = inlined_call_operand.hbm [shape: f32[1,1], index: 10, kind: output, shape index: {2}]  }
   0x1   :  { %17 = vsyncpa [#allocation7], 0 }
   0x2   :  { %18 = vsyncpa [#allocation4], 0 }
   0x3   :  { %19 = vsyncpa [#allocation5], 0  ;;  %s788_s13 = smov [#allocation6]   ;;  %s789_s15 = smov [#allocation2]  }
   0x4   :  { %s38_s14 = sshll.u32 %s788_s13, 4  ;;  %s25_s16 = sshll.u32 %s789_s15, 4  ;;  %s39_s14 = int_to_ptr.vmem [resolvable:$true] %s38_s14  ;;  %s855_s16 = int_to_ptr.vmem [resolvable:$true] %s25_s16 }
   0x5   :  { %s682_s19 = scalar_lea.hbm %s1081_s1, 128 }
   0x6   :  { %p683_p0 = scmp.ne.s32.totalorder %s1081_s1, %s682_s19  ;;  %p686_p1 = scmp.lt.u32.totalorder %s682_s19, %s1081_s1 }
   0x8   :  { %p688_p2 = pnand %p686_p1, %p683_p0 }
   0xa   :  { %691 = shalt.err (!%p688_p2)
}
   0xb   :  { %s692_s24 = scalar_lea.vmem %s39_s14, 128  ;;  %p697_p4 = scmp.lt.s32.totalorder %s39_s14, %s39_s14 }
   0xc   :  { %p693_p3 = scmp.ne.s32.totalorder %s39_s14, %s692_s24  ;;  %p698_p5 = scmp.lt.s32.totalorder %s692_s24, %s692_s24 }
   0xe   :  { %p699_p6 = por %p698_p5, %p697_p4 }
  0x10   :  { %p700_p7 = pnand %p699_p6, %p693_p3 }
  0x12   :  { %703 = shalt.err (!%p700_p7)
}
  0x13   :  { %41 = dma.hbm_to_vmem [thread:$0]  %s1081_s1, 128, %s39_s14, [#allocation7]  }
  0x14   :  { %s704_s29 = scalar_lea.hbm %s1080_s0, 256 }
  0x15   :  { %p705_p8 = scmp.ne.s32.totalorder %s1080_s0, %s704_s29  ;;  %p708_p9 = scmp.lt.u32.totalorder %s704_s29, %s1080_s0 }
  0x17   :  { %p710_p10 = pnand %p708_p9, %p705_p8 }
  0x19   :  { %713 = shalt.err (!%p710_p10)
}
  0x1a   :  { %s714_s15 = scalar_lea.vmem %s855_s16, 256  ;;  %p719_p12 = scmp.lt.s32.totalorder %s855_s16, %s855_s16 }
  0x1b   :  { %p715_p11 = scmp.ne.s32.totalorder %s855_s16, %s714_s15  ;;  %p720_p13 = scmp.lt.s32.totalorder %s714_s15, %s714_s15 }
  0x1d   :  { %p721_p0 = por %p720_p13, %p719_p12 }
  0x1f   :  { %p722_p1 = pnand %p721_p0, %p715_p11 }
  0x21   :  { %725 = shalt.err (!%p722_p1)
}
  0x22   :  { %s790_s1 = smov 128   ;;  %s791_s14 = smov 8  }
  0x23   :  { %31 = dma.hbm_to_vmem [thread:$0]  %s1080_s0, 256, %s855_s16, [#allocation3], %s790_s1, %s790_s1, %s791_s14  }
  0x24   :  { %s792_s19 = smov [#allocation8]   ;;  %s726_s23 = scalar_lea.hbm %s1086_s6, 2048 }
  0x25   :  { %s55_s20 = sshll.u32 %s792_s19, 4  ;;  %p727_p2 = scmp.ne.s32.totalorder %s1086_s6, %s726_s23  ;;  %s56_s20 = int_to_ptr.vmem [resolvable:$true] %s55_s20 }
  0x26   :  { %p730_p3 = scmp.lt.u32.totalorder %s726_s23, %s1086_s6 }
  0x28   :  { %p732_p4 = pnand %p730_p3, %p727_p2 }
  0x2a   :  { %735 = shalt.err (!%p732_p4)
}
  0x2b   :  { %s736_s28 = scalar_lea.vmem %s56_s20, 2048  ;;  %p741_p6 = scmp.lt.s32.totalorder %s56_s20, %s56_s20 }
  0x2c   :  { %p737_p5 = scmp.ne.s32.totalorder %s56_s20, %s736_s28  ;;  %p742_p7 = scmp.lt.s32.totalorder %s736_s28, %s736_s28 }
  0x2e   :  { %p743_p8 = por %p742_p7, %p741_p6 }
  0x30   :  { %p744_p9 = pnand %p743_p8, %p737_p5 }
  0x32   :  { %747 = shalt.err (!%p744_p9)
}
  0x33   :  { %s793_s0 = smov 512   ;;  %s794_s16 = smov 32  }
  0x34   :  { %61 = dma.hbm_to_vmem [thread:$0]  %s1086_s6, 2048, %s56_s20, [#allocation7], %s793_s0, %s793_s0, %s794_s16  }
  0x35   :  { %780 = dma.done.wait [#allocation3], 256  }
  0x36   :  { %781 = vsyncadd [#allocation3], 4294967040 }
  0x37   :  { %782 = dma.done.wait [#allocation7], 2176  }
  0x38   :  { %783 = vsyncadd [#allocation7], 4294965120  ;;  %v795_v0 = vmov 0.0   ;;  %vm796_vm0 = vmmov 0   ;;  %v78_v1 = vld [vmem:[%s1082_s2] sm:$0xff]  ;;  %v79_v2 = vld [vmem:[%s1082_s2 + $0x8] sm:$0xff]  ;;  %v84_v17 = vlaneseq }
  0x39   :  { %620 = vmatprep.subr.bf16.mxu0 %v795_v0  ;;  %628 = vmatprep.subr.bf16.mxu1 %v795_v0  ;;  %v133_v3 = vld [vmem:[%s1083_s3] sm:$0xff]  ;;  %v82_v4 = vpack.c.bf16 %v79_v2, %v78_v1  ;;  %v134_v5 = vld [vmem:[%s1083_s3 + $0x8] sm:$0xff]  ;;  %v80_v6 = vld [vmem:[%s1082_s2 + $0x10] sm:$0xff]  ;;  %vm88_vm1 = vcmask 261120   ;;  %vm190_vm2 = vcmask 257024   ;;  %v797_v58 = vmov 0  }
  0x3a   :  { %624 = vmatprep.mubr.msk.bf16.mxu0 %vm796_vm0, %v795_v0  ;;  %632 = vmatprep.mubr.msk.bf16.mxu1 %vm796_vm0, %v795_v0  ;;  %v81_v7 = vld [vmem:[%s1082_s2 + $0x18] sm:$0xff]  ;;  %v137_v8 = vpack.c.bf16 %v134_v5, %v133_v3  ;;  %v135_v9 = vld [vmem:[%s1083_s3 + $0x10] sm:$0xff]  ;;  %v74_v11 = vld [vmem:[#allocation2] sm:$0xff]  ;;  %v936_v18 = vshrl.u32 %v84_v17, 7  ;;  %vm389_vm4 = vcmask 523264   ;;  %vm549_vm5 = vcmask 7168  }
  0x3b   :  { %v136_v10 = vld [vmem:[%s1083_s3 + $0x18] sm:$0xff]  ;;  %621 = vmatpush3.bf16.msra.mxu0 %v82_v4  ;;  %v83_v12 = vpack.c.bf16 %v81_v7, %v80_v6  ;;  %v75_v13 = vld [vmem:[#allocation2 + $0x8] sm:$0xf]  ;;  %v942_v20 = vld [vmem:[%s1087_s7] sm:$0x3f] }
  0x3c   :  { %629 = vmatpush3.bf16.msra.mxu1 %v137_v8  ;;  %622 = vmatprep.subr.bf16.mxu0 %v795_v0  ;;  %v138_v14 = vpack.c.bf16 %v136_v10, %v135_v9  ;;  %v929_v15 = vpack.c.bf16 %v75_v13, %v74_v11  ;;  %v86_v19 = vsub.s32 0, %v936_v18  ;;  %v214_v34 = vld [vmem:[#allocation8 + $0x8] sm:$0xff]  ;;  %v216_v36 = vld [vmem:[#allocation8 + $0x18] sm:$0xff]  ;;  %v213_v38 = vld [vmem:[#allocation8] sm:$0xff]  ;;  %vm384_vm3 = vcmp.lt.s32.totalorder %v936_v18, 4 }
  0x3d   :  { %630 = vmatprep.subr.bf16.mxu1 %v795_v0  ;;  %v218_v35 = vld [vmem:[#allocation8 + $0x28] sm:$0xff]  ;;  %v217_v39 = vld [vmem:[#allocation8 + $0x20] sm:$0xff]  ;;  %v220_v40 = vld [vmem:[#allocation8 + $0x38] sm:$0xff] }
  0x3e   :  { %v144_v16 = vrot.slane %v929_v15, 4  ;;  %v87_v21 = vrot.slane %v942_v20, %v86_v19  ;;  %v230_v37 = vpack.c.bf16 %v218_v35, %v214_v34  ;;  %v229_v41 = vpack.c.bf16 %v217_v39, %v213_v38  ;;  %v215_v43 = vld [vmem:[#allocation8 + $0x10] sm:$0xff]  ;;  %v222_v46 = vld [vmem:[#allocation8 + $0x48] sm:$0xff]  ;;  %v224_v48 = vld [vmem:[#allocation8 + $0x58] sm:$0xff] }
  0x3f   :  { %623 = vmatpush3.bf16.msra.mxu0 %v83_v12  ;;  %v232_v42 = vpack.c.bf16 %v220_v40, %v216_v36  ;;  %v219_v44 = vld [vmem:[#allocation8 + $0x30] sm:$0xff]  ;;  %v226_v47 = vld [vmem:[#allocation8 + $0x68] sm:$0xff]  ;;  %v221_v50 = vld [vmem:[#allocation8 + $0x40] sm:$0xff]  ;;  %v1009_v35 = vsel %vm384_vm3, 1.0, %v795_v0 }
  0x40   :  { %631 = vmatpush3.bf16.msra.mxu1 %v138_v14  ;;  %240 = vmatprep.subr.bf16.mxu0 %v230_v37  ;;  %v231_v45 = vpack.c.bf16 %v219_v44, %v215_v43  ;;  %v234_v49 = vpack.c.bf16 %v226_v47, %v222_v46  ;;  %v225_v51 = vld [vmem:[#allocation8 + $0x60] sm:$0xff]  ;;  %v228_v52 = vld [vmem:[#allocation8 + $0x78] sm:$0xff]  ;;  %v223_v55 = vld [vmem:[#allocation8 + $0x50] sm:$0xff]  ;;  %v1013_v37 = vsub.f32 1.0, %v1009_v35 }
  0x41   :  { %281 = vmatprep.subr.bf16.mxu1 %v232_v42  ;;  %v233_v53 = vpack.c.bf16 %v225_v51, %v221_v50  ;;  %v236_v54 = vpack.c.bf16 %v228_v52, %v224_v48  ;;  %v227_v56 = vld [vmem:[#allocation8 + $0x70] sm:$0xff]  ;;  %v332_v63 = vld [vmem:[%s1084_s4] sm:$0xff]  ;;  %v334_v5 = vld [vmem:[%s1084_s4 + $0x10] sm:$0xff] }
  0x42   :  { %625 = vmatmul.mubr.msk.bf16.vlgmr.msra.gmra.mrb[0].mxu0 %vm88_vm1, %v929_v15  ;;  %v235_v57 = vpack.c.bf16 %v227_v56, %v223_v55  ;;  %v333_v1 = vld [vmem:[%s1084_s4 + $0x8] sm:$0xff]  ;;  %v335_v6 = vld [vmem:[%s1084_s4 + $0x18] sm:$0xff]  ;;  %v471_v8 = vld [vmem:[%s1085_s5] sm:$0xff] }
  0x43   :  { %633 = vmatmul.mubr.msk.bf16.vlgmr.msra.gmra.mrb[0].mxu1 %vm88_vm1, %v144_v16  ;;  %241 = vmatpush1.bf16.msra.mxu0 %v229_v41  ;;  %v336_v3 = vpack.c.bf16 %v333_v1, %v332_v63  ;;  %v337_v7 = vpack.c.bf16 %v335_v6, %v334_v5  ;;  %v472_v9 = vld [vmem:[%s1085_s5 + $0x8] sm:$0xff]  ;;  %v473_v10 = vld [vmem:[%s1085_s5 + $0x10] sm:$0xff]  ;;  %v474_v12 = vld [vmem:[%s1085_s5 + $0x18] sm:$0xff] }
  0x44   :  { %282 = vmatpush1.bf16.msra.mxu1 %v231_v45  ;;  %242 = vmatprep.subr.bf16.mxu0 %v234_v49  ;;  %v479_v11 = vpack.c.bf16 %v472_v9, %v471_v8  ;;  %v480_v13 = vpack.c.bf16 %v474_v12, %v473_v10  ;;  %v475_v14 = vld [vmem:[%s1085_s5 + $0x20] sm:$0xff]  ;;  %v477_v17 = vld [vmem:[%s1085_s5 + $0x30] sm:$0xff]  ;;  %v478_v19 = vld [vmem:[%s1085_s5 + $0x38] sm:$0xff] }
  0x45   :  { %283 = vmatprep.subr.bf16.mxu1 %v236_v54  ;;  %272 = vmatprep.mubr.bf16.mxu0 %v797_v58 }
  0x46   :  { %313 = vmatprep.mubr.bf16.mxu1 %v797_v58 }
  0x47   :  { %243 = vmatpush1.bf16.msra.mxu0 %v233_v53 }
  0x48   :  { %284 = vmatpush1.bf16.msra.mxu1 %v235_v57  ;;  %636 = vmatprep.subr.bf16.mxu0 %v795_v0 }
  0x49   :  { %644 = vmatprep.subr.bf16.mxu1 %v795_v0 }
 0x115   :  { %v126_v22 = vpop.f32.mrb[0].mxu0 }
 0x116   :  { %v127_v23 = vadd.f32 %v126_v22, %v87_v21  ;;  %v945_v24 = vpop.f32.mrb[0].mxu1  ;;  %v626_v25 = vpop.f32.mrb[1].mxu0  ;;  %v482_v21 = vpack.c.bf16 %v478_v19, %v477_v17 }
 0x117   :  { %v129_v26 = vpop.f32.mrb[2].mxu0  ;;  %v634_v27 = vpop.f32.mrb[1].mxu1 }
 0x118   :  { %v947_v28 = vmax.f32 %v127_v23, 0.0  ;;  %v627_v29 = vpop.f32.mrb[3].mxu0  ;;  %v185_v30 = vpop.f32.mrb[2].mxu1  ;;  %v340_v27 = vsub.s32 2, %v936_v18 }
 0x119   :  { %v635_v31 = vpop.f32.mrb[3].mxu1 }
 0x11a   :  { %v189_v32 = vmul.f32 %v947_v28, %v947_v28  ;;  %v341_v36 = vrot.slane %v942_v20, %v340_v27 }
 0x11c   :  { %v191_v33 = vsel %vm190_vm2, %v189_v32, 0.0 }
 0x11d   :  { %192 = vadd.xlane.f32.xlu0 %v191_v33 }
 0x1aa   :  { %v193_v59 = vpop.xlane.xlu0 %192 }
 0x1ab   :  { %v202_v60 = vmax.f32 %v193_v59, 1e-24 }
 0x1ad   :  { %670 = vrsqrt.f32 %v202_v60 }
 0x1b7   :  { %v671_v61 = vpop.eup %670 }
 0x1b8   :  { %v954_v62 = vmul.f32 14.285714, %v671_v61 }
 0x1ba   :  { %v211_v2 = vmul.f32 %v954_v62, %v947_v28 }
 0x1bc   :  { %v212_v4 = vpack.c.bf16 %v211_v2, %v211_v2 }
 0x1be   :  { %601 = vmatmul.mubr.msk.bf16.vlgmr.msra.gmra.mrb[4].mxu0 %vm88_vm1, %v212_v4  ;;  %602 = vmatmul.mubr.msk.bf16.vlgmr.msra.gmra.mrb[4].mxu1 %vm88_vm1, %v212_v4 }
 0x1bf   :  { %637 = vmatpush3.bf16.msra.mxu0 %v336_v3  ;;  %640 = vmatprep.mubr.msk.bf16.mxu0 %vm796_vm0, %v795_v0 }
 0x1c0   :  { %638 = vmatprep.subr.bf16.mxu0 %v795_v0  ;;  %652 = vmatprep.mubr.msk.bf16.mxu1 %vm796_vm0, %v795_v0 }
 0x1c1   :  { %645 = vmatpush3.bf16.msra.mxu1 %v479_v11 }
 0x1c2   :  { %646 = vmatprep.subr.bf16.mxu1 %v795_v0 }
 0x1c3   :  { %639 = vmatpush3.bf16.msra.mxu0 %v337_v7 }
 0x1c5   :  { %647 = vmatpush3.bf16.msra.mxu1 %v480_v13 }
 0x1c6   :  { %641 = vmatmul.mubr.msk.bf16.vlgmr.msra.gmra.mrb[8].mxu0 %vm88_vm1, %v929_v15  ;;  %v476_v15 = vld [vmem:[%s1085_s5 + $0x28] sm:$0xff]  ;;  %648 = vmatprep.subr.bf16.mxu1 %v795_v0  ;;  %s798_s5 = smov [#allocation9]  }
 0x1c7   :  { %v481_v16 = vpack.c.bf16 %v476_v15, %v475_v14  ;;  %s574_s25 = sshll.u32 %s798_s5, 4  ;;  %s575_s25 = int_to_ptr.vmem [resolvable:$true] %s574_s25 }
 0x1c8   :  { %s748_s2 = scalar_lea.vmem %s575_s25, 256  ;;  %p753_p11 = scmp.lt.s32.totalorder %s575_s25, %s575_s25 }
 0x1c9   :  { %649 = vmatpush3.bf16.msra.mxu1 %v481_v16  ;;  %p749_p10 = scmp.ne.s32.totalorder %s575_s25, %s748_s2  ;;  %p754_p12 = scmp.lt.s32.totalorder %s748_s2, %s748_s2 }
 0x1ca   :  { %650 = vmatprep.subr.bf16.mxu1 %v795_v0 }
 0x1cb   :  { %p755_p13 = por %p754_p12, %p753_p11 }
 0x1cd   :  { %651 = vmatpush3.bf16.msra.mxu1 %v482_v21  ;;  %p756_p0 = pnand %p755_p13, %p749_p10 }
 0x291   :  { %v274_v22 = vpop.f32.mrb[4].mxu0  ;;  %v315_v23 = vpop.f32.mrb[4].mxu1 }
 0x292   :  { %v276_v25 = vpop.f32.mrb[5].mxu0  ;;  %v317_v26 = vpop.f32.mrb[5].mxu1 }
 0x293   :  { %v326_v29 = vcombine.low %v274_v22, %v276_v25  ;;  %v327_v30 = vcombine.low %v315_v23, %v317_v26  ;;  %v278_v31 = vpop.f32.mrb[6].mxu0  ;;  %v319_v32 = vpop.f32.mrb[6].mxu1  ;;  %v447_v25 = vsub.s32 3, %v936_v18 }
 0x294   :  { %v279_v33 = vpop.f32.mrb[7].mxu0  ;;  %v320_v34 = vpop.f32.mrb[7].mxu1 }
 0x295   :  { %330 = vst [vmem:[#allocation9] sm:$0xff] %v326_v29  ;;  %331 = vst [vmem:[#allocation9 + $0x8] sm:$0xff] %v327_v30 }
 0x299   :  { %v376_v38 = vpop.f32.mrb[8].mxu0 }
 0x29a   :  { %v1015_v39 = vadd.f32 %v376_v38, %v341_v36  ;;  %v642_v40 = vpop.f32.mrb[9].mxu0 }
 0x29b   :  { %v379_v41 = vpop.f32.mrb[10].mxu0  ;;  %v458_v40 = vsub.s32 4, %v936_v18 }
 0x29c   :  { %v388_v42 = vmul.f32 %v1009_v35, %v1015_v39  ;;  %v417_v43 = vmul.f32 %v1013_v37, %v1015_v39  ;;  %v643_v44 = vpop.f32.mrb[11].mxu0 }
 0x29e   :  { %v390_v0 = vsel %vm389_vm4, %v388_v42, 0.0  ;;  %v418_v45 = vsel %vm389_vm4, %v417_v43, 0.0 }
 0x29f   :  { %v391_v46 = vrot.slane %v390_v0, 4  ;;  %v419_v47 = vrot.slane %v418_v45, 4 }
 0x2a1   :  { %v392_v48 = vadd.f32 %v391_v46, %v390_v0  ;;  %v420_v49 = vadd.f32 %v419_v47, %v418_v45 }
 0x2a3   :  { %v393_v50 = vrot.slane %v392_v48, 2  ;;  %v421_v51 = vrot.slane %v420_v49, 2 }
 0x2a5   :  { %v394_v52 = vadd.f32 %v393_v50, %v392_v48  ;;  %v422_v53 = vadd.f32 %v421_v51, %v420_v49 }
 0x2a7   :  { %v395_v54 = vrot.slane %v394_v52, 1  ;;  %v423_v55 = vrot.slane %v422_v53, 1 }
 0x2a9   :  { %v396_v56 = vadd.f32 %v395_v54, %v394_v52  ;;  %v424_v57 = vadd.f32 %v423_v55, %v422_v53  ;;  %v530_v54 = vld [vmem:[#allocation6] sm:$0xff] }
 0x2aa   :  { %v535_v55 = vmul.f32 %v530_v54, %v530_v54 }
 0x2ab   :  { %v397_v58 = vmul.f32 0.25, %v396_v56  ;;  %v425_v59 = vmul.f32 0.25, %v424_v57  ;;  %v141_v57 = vsub.s32 1, %v936_v18 }
 0x2ac   :  { %v536_v56 = vsel %vm88_vm1, %v535_v55, 0.0 }
 0x2ad   :  { %v398_v60 = vsub.f32 %v1015_v39, %v397_v58  ;;  %v426_v61 = vsub.f32 %v1015_v39, %v425_v59  ;;  %537 = vadd.xlane.f32.xlu1 %v536_v56 }
 0x2af   :  { %v399_v63 = vmul.f32 %v398_v60, %v398_v60  ;;  %v427_v1 = vmul.f32 %v426_v61, %v426_v61 }
 0x2b1   :  { %v400_v2 = vmul.f32 %v1009_v35, %v399_v63  ;;  %v428_v3 = vmul.f32 %v427_v1, %v1013_v37 }
 0x2b3   :  { %v401_v4 = vsel %vm389_vm4, %v400_v2, 0.0  ;;  %v429_v5 = vsel %vm389_vm4, %v428_v3, 0.0 }
 0x2b4   :  { %v402_v6 = vrot.slane %v401_v4, 4  ;;  %v430_v7 = vrot.slane %v429_v5, 4 }
 0x2b6   :  { %v403_v8 = vadd.f32 %v402_v6, %v401_v4  ;;  %v431_v9 = vadd.f32 %v430_v7, %v429_v5 }
 0x2b8   :  { %v404_v10 = vrot.slane %v403_v8, 2  ;;  %v432_v11 = vrot.slane %v431_v9, 2 }
 0x2ba   :  { %v405_v12 = vadd.f32 %v404_v10, %v403_v8  ;;  %v433_v13 = vadd.f32 %v432_v11, %v431_v9 }
 0x2bc   :  { %v406_v14 = vrot.slane %v405_v12, 1  ;;  %v434_v15 = vrot.slane %v433_v13, 1 }
 0x2be   :  { %v407_v16 = vadd.f32 %v406_v14, %v405_v12  ;;  %v435_v17 = vadd.f32 %v434_v15, %v433_v13 }
 0x2c0   :  { %v408_v19 = vmul.f32 0.25, %v407_v16  ;;  %v436_v21 = vmul.f32 0.25, %v435_v17 }
 0x2c2   :  { %v409_v22 = vadd.f32 1e-05, %v408_v19  ;;  %v437_v23 = vadd.f32 1e-05, %v436_v21 }
 0x2c4   :  { %672 = vrsqrt.f32 %v409_v22 }
 0x2c5   :  { %674 = vrsqrt.f32 %v437_v23 }
 0x2ce   :  { %v673_v26 = vpop.eup %672 }
 0x2cf   :  { %v675_v27 = vpop.eup %674  ;;  %v411_v29 = vmul.f32 %v673_v26, %v942_v20 }
 0x2d0   :  { %v439_v30 = vmul.f32 %v675_v27, %v942_v20 }
 0x2d1   :  { %v412_v31 = vmul.f32 %v411_v29, %v397_v58  ;;  %v448_v32 = vrot.slane %v411_v29, %v447_v25  ;;  %v485_v58 = vsub.s32 5, %v936_v18 }
 0x2d2   :  { %v440_v33 = vmul.f32 %v439_v30, %v425_v59  ;;  %v453_v34 = vrot.slane %v439_v30, %v447_v25 }
 0x2d3   :  { %v414_v36 = vrot.slane %v412_v31, 7  ;;  %v449_v38 = vmul.f32 %v1009_v35, %v448_v32 }
 0x2d4   :  { %v442_v41 = vrot.slane %v440_v33, 7  ;;  %v454_v42 = vmul.f32 %v453_v34, %v1013_v37 }
 0x2d5   :  { %v416_v43 = vsub.f32 %v942_v20, %v414_v36 }
 0x2d6   :  { %v444_v44 = vsub.f32 %v942_v20, %v442_v41  ;;  %v455_v0 = vadd.f32 %v454_v42, %v449_v38 }
 0x2d7   :  { %v459_v45 = vrot.slane %v416_v43, %v458_v40 }
 0x2d8   :  { %v464_v46 = vrot.slane %v444_v44, %v458_v40  ;;  %v467_v47 = vmul.f32 %v455_v0, %v1015_v39  ;;  %v142_v39 = vrot.slane %v942_v20, %v141_v57 }
 0x2d9   :  { %v460_v48 = vmul.f32 %v1009_v35, %v459_v45  ;;  %v486_v35 = vrot.slane %v942_v20, %v485_v58 }
 0x2da   :  { %v465_v49 = vmul.f32 %v464_v46, %v1013_v37  ;;  %v183_v37 = vadd.f32 %v945_v24, %v142_v39 }
 0x2dc   :  { %v466_v50 = vadd.f32 %v465_v49, %v460_v48  ;;  %v188_v1 = vmax.f32 %v183_v37, 0.0 }
 0x2de   :  { %v468_v51 = vadd.f32 %v467_v47, %v466_v50  ;;  %v194_v7 = vmul.f32 %v188_v1, %v188_v1  ;;  %v198_v16 = vmul.f32 %v188_v1, %v947_v28 }
 0x2e0   :  { %v469_v52 = vmax.f32 %v468_v51, 0.0  ;;  %v195_v18 = vsel %vm190_vm2, %v194_v7, 0.0  ;;  %v199_v17 = vsel %vm190_vm2, %v198_v16, 0.0 }
 0x2e2   :  { %v470_v53 = vpack.c.bf16 %v469_v52, %v469_v52 }
 0x2e4   :  { %653 = vmatmul.mubr.msk.bf16.vlgmr.msra.gmra.mrb[8].mxu1 %vm389_vm4, %v470_v53 }
 0x33a   :  { %v538_v20 = vpop.xlane.xlu1 %537 }
 0x33b   :  { %v546_v24 = vmax.f32 %v538_v20, 1e-24 }
 0x33d   :  { %676 = vrsqrt.f32 %v546_v24 }
 0x347   :  { %v677_v10 = vpop.eup %676 }
 0x3b7   :  { %v524_v59 = vpop.f32.mrb[8].mxu1 }
 0x3b8   :  { %v525_v60 = vadd.f32 %v524_v59, %v486_v35  ;;  %v654_v61 = vpop.f32.mrb[9].mxu1 }
 0x3b9   :  { %v527_v63 = vpop.f32.mrb[10].mxu1 }
 0x3ba   :  { %v655_v2 = vpop.f32.mrb[11].mxu1  ;;  %v539_v3 = vmul.f32 %v530_v54, %v525_v60  ;;  %v531_v4 = vmul.f32 %v525_v60, %v525_v60 }
 0x3bc   :  { %v540_v5 = vsel %vm88_vm1, %v539_v3, 0.0  ;;  %v532_v6 = vsel %vm88_vm1, %v531_v4, 0.0 }
 0x3bd   :  { %541 = vadd.xlane.f32.xlu1 %v540_v5  ;;  %533 = vadd.xlane.f32.xlu0 %v532_v6 }
 0x3c1   :  { %196 = vadd.xlane.f32.xlu1 %v195_v18 }
 0x44a   :  { %v534_v8 = vpop.xlane.xlu0 %533  ;;  %v542_v12 = vpop.xlane.xlu1 %541 }
 0x44b   :  { %v543_v9 = vmax.f32 %v534_v8, 1e-24 }
 0x44d   :  { %678 = vrsqrt.f32 %v543_v9 }
 0x457   :  { %v679_v11 = vpop.eup %678 }
 0x458   :  { %v545_v13 = vmul.f32 %v679_v11, %v542_v12 }
 0x45a   :  { %v548_v14 = vmul.f32 %v677_v10, %v545_v13 }
 0x45c   :  { %v550_v15 = vsel %vm549_vm5, %v548_v14, 0.0 }
 0x45d   :  { %551 = vadd.xlane.f32.xlu0 %v550_v15 }
 0x461   :  { %200 = vadd.xlane.f32.xlu0 %v199_v17 }
 0x462   :  { %759 = shalt.err (!%p756_p0)
}
 0x463   :  { %s760_s26 = scalar_lea.hbm %s1089_s9, 256 }
 0x464   :  { %p761_p1 = scmp.ne.s32.totalorder %s1089_s9, %s760_s26  ;;  %p764_p2 = scmp.lt.u32.totalorder %s760_s26, %s1089_s9 }
 0x466   :  { %p766_p3 = pnand %p764_p2, %p761_p1 }
 0x468   :  { %769 = shalt.err (!%p766_p3)
}
 0x469   :  { %577 = dma.vmem_to_hbm [thread:$0]  %s575_s25, 256, %s1089_s9, [#allocation4]   ;;  %v197_v28 = vpop.xlane.xlu1 %196  ;;  %vm209_vm6 = vcmask 3072  }
 0x46a   :  { %v205_v19 = vmax.f32 %v197_v28, 1e-24  ;;  %s770_s1 = scalar_lea.hbm %s1090_s10, 16 }
 0x46b   :  { %p771_p4 = scmp.ne.s32.totalorder %s1090_s10, %s770_s1  ;;  %p774_p5 = scmp.lt.u32.totalorder %s770_s1, %s1090_s10 }
 0x46c   :  { %680 = vrsqrt.f32 %v205_v19 }
 0x46d   :  { %p776_p6 = pnand %p774_p5, %p771_p4 }
 0x476   :  { %v681_v29 = vpop.eup %680 }
 0x4ea   :  { %v552_v21 = vpop.xlane.xlu0 %551 }
 0x4eb   :  { %v553_v22 = vrot.slane %v552_v21, 4 }
 0x4ed   :  { %v554_v23 = vadd.f32 %v553_v22, %v552_v21 }
 0x4ee   :  { %v201_v25 = vpop.xlane.xlu0 %200 }
 0x4ef   :  { %v555_v26 = vrot.slane %v554_v23, 2  ;;  %v207_v27 = vmul.f32 %v954_v62, %v201_v25 }
 0x4f1   :  { %v208_v30 = vmul.f32 %v681_v29, %v207_v27  ;;  %v556_v31 = vadd.f32 %v555_v26, %v554_v23 }
 0x4f3   :  { %210 = vst.msk [vmem:[%s1088_s8] sm:$0xf] %vm209_vm6, %v208_v30  ;;  %v557_v32 = vrot.slane %v556_v31, 1 }
 0x4f5   :  { %v558_v33 = vadd.f32 %v557_v32, %v556_v31 }
 0x4f7   :  { %656 = vpush %v558_v33 }
 0x528   :  { %s657_s9 = spop %656 }
 0x529   :  { %s562_s12 = smul.f32 0.125, %s657_s9 }
 0x52b   :  { %s563_s6 = ssub.f32 0.0, %s562_s12 }
 0x52d   :  { %565 = sst [smem:[#allocation10]] %s563_s6 }
 0x52e   :  { %779 = shalt.err (!%p776_p6)
}
 0x52f   :  { %s799_s8 = smov [#allocation10]  }
 0x530   :  { %585 = dma.smem_to_hbm %s799_s8, 16, %s1090_s10, [#allocation5]  }
 0x531   :  { %784 = dma.done.wait [#allocation4], 256  }
 0x532   :  { %785 = vsyncadd [#allocation4], 4294967040 }
 0x533   :  { %786 = dma.done.wait [#allocation5], 16  }
 0x534   :  { %787 = vsyncadd [#allocation5], 4294967280 }
 0x535   :  { %594 = sfence }
 0x536   :  { %595 = vsyncpa [#allocation3], 1 }
 0x537   :  { %596 = vsyncpa [#allocation7], 1 }
 0x538   :  { %597 = vsyncpa [#allocation4], 1 }
 0x539   :  { %598 = vsyncpa [#allocation5], 1 }

</bundles_post_ra>
